<compile_context>
chip_gen: v5e
topology: v5e:2x2
jax: 0.10.0
libtpu: 0.0.40
codegen_flags: <defaults>
</compile_context>

<pallas_src>
import functools

import jax
import jax.numpy as jnp
from jax.experimental import pallas as pl
from jax.experimental.pallas import tpu as pltpu

IN_FEATURES = 36 * 36   # 1296
H1, H2, OUT = 32, 16, 2


def mlp_kernel(x_ref, w1_ref, b1_ref, w2_ref, b2_ref, w3_ref, b3_ref, out_ref):
    x = x_ref[...]                                                     # (TB, 1296)
    h1 = jnp.dot(x, w1_ref[...], preferred_element_type=jnp.float32) + b1_ref[...]
    h1 = jnp.maximum(h1, 0.0)                                          # ReLU
    h2 = jnp.dot(h1, w2_ref[...], preferred_element_type=jnp.float32) + b2_ref[...]
    h2 = jnp.maximum(h2, 0.0)                                          # ReLU
    y = jnp.dot(h2, w3_ref[...], preferred_element_type=jnp.float32) + b3_ref[...]
    out_ref[...] = y.astype(out_ref.dtype)


def _round_up(n, m):
    return ((n + m - 1) // m) * m


@functools.partial(jax.jit, static_argnames=("block_b",))
def mlp_forward(x, params, *, block_b=None):
    """x: any shape reshapable to (-1, 36*36); returns (B, 2) float32."""
    w1, b1, w2, b2, w3, b3 = params

    x2d = x.reshape((-1, IN_FEATURES))
    # Stream x in the dtype it already lives in (no extra HBM copy). Only unusual
    # dtypes get normalized to f32.
    if x2d.dtype == jnp.bfloat16:
        act_dtype = jnp.bfloat16
    else:
        act_dtype = jnp.float32
        if x2d.dtype != jnp.float32:
            x2d = x2d.astype(jnp.float32)

    # Weights are tiny and fetched once; match w1 to the activation dtype for the MXU.
    w1 = w1.astype(act_dtype)
    b1 = b1.astype(jnp.float32).reshape(1, H1)
    w2 = w2.astype(jnp.float32)
    b2 = b2.astype(jnp.float32).reshape(1, H2)
    w3 = w3.astype(jnp.float32)
    b3 = b3.astype(jnp.float32).reshape(1, OUT)

    B = x2d.shape[0]
    itemsize = 2 if act_dtype == jnp.bfloat16 else 4

    # Batch tile: big enough to amortize per-step overhead, capped so the
    # double-buffered x tile fits every generation's VMEM; small batches shrink
    # the tile so the "parallel" grid has >=2 tiles for v7x megacore.
    cap = block_b if block_b is not None else (4096 if itemsize == 2 else 2048)
    cap = max(8, _round_up(int(cap), 8))
    TB = min(cap, max(8, _round_up(-(-B // 2), 8)))
    grid = (pl.cdiv(B, TB),)

    lane_x = _round_up(IN_FEATURES, 128)              # 1296 -> 1408 lanes in VMEM
    vmem_limit = (2 * TB * lane_x * itemsize          # double-buffered x tile
                  + 2 * TB * 128 * 4                  # double-buffered out tile (lane-padded)
                  + 2 * IN_FEATURES * 128 * itemsize  # double-buffered w1
                  + (2 << 20)                         # small params / biases
                  + (10 << 20))                       # h1/h2 temporaries + compiler scratch
    vmem_limit = int(min(vmem_limit, 56 << 20))       # stay inside v7x's 64 MiB physical VMEM

    weight_bytes = sum(int(a.size) * a.dtype.itemsize for a in (w1, b1, w2, b2, w3, b3))
    cost = pl.CostEstimate(
        flops=2 * grid[0] * TB * (IN_FEATURES * H1 + H1 * H2 + H2 * OUT),
        transcendentals=0,
        bytes_accessed=B * IN_FEATURES * itemsize + B * OUT * 4 + weight_bytes,
    )

    resident = lambda shape: pl.BlockSpec(shape, lambda i: (0,) * len(shape))

    out = pl.pallas_call(
        mlp_kernel,
        out_shape=jax.ShapeDtypeStruct((B, OUT), jnp.float32),
        grid_spec=pltpu.PrefetchScalarGridSpec(
            num_scalar_prefetch=0,
            grid=grid,
            in_specs=[
                pl.BlockSpec((TB, IN_FEATURES), lambda i: (i, 0)),   # streamed x tile
                resident(w1.shape), resident(b1.shape),              # VMEM-resident params
                resident(w2.shape), resident(b2.shape),
                resident(w3.shape), resident(b3.shape),
            ],
            out_specs=pl.BlockSpec((TB, OUT), lambda i: (i, 0)),
        ),
        compiler_params=pltpu.CompilerParams(
            dimension_semantics=("parallel",),        # batch tiles split across TCs on v7x
            vmem_limit_bytes=vmem_limit,
        ),
        cost_estimate=cost,
    )(x2d, w1, b1, w2, b2, w3, b3)

    return out


def init_params(key):
    """Deterministic init mirroring nn.Linear default (U[-1/sqrt(fan_in), +...])."""
    def linear(k, fan_in, fan_out):
        kw, kb = jax.random.split(k)
        bound = 1.0 / jnp.sqrt(jnp.float32(fan_in))
        # stored as (in, out) so the kernel does x @ W + b  ==  PyTorch x @ W.T + b
        w = jax.random.uniform(kw, (fan_in, fan_out), jnp.float32, -bound, bound)
        b = jax.random.uniform(kb, (1, fan_out), jnp.float32, -bound, bound)
        return w, b

    k1, k2, k3 = jax.random.split(key, 3)
    w1, b1 = linear(k1, IN_FEATURES, H1)
    w2, b2 = linear(k2, H1, H2)
    w3, b3 = linear(k3, H2, OUT)
    return (w1, b1, w2, b2, w3, b3)


def mlp_reference(x, params):
    w1, b1, w2, b2, w3, b3 = params
    x2d = x.reshape((-1, IN_FEATURES)).astype(jnp.float32)
    h1 = jax.nn.relu(x2d @ w1 + b1)
    h2 = jax.nn.relu(h1 @ w2 + b2)
    return h2 @ w3 + b3


if __name__ == "__main__":
    key = jax.random.PRNGKey(0)
    kx, kp = jax.random.split(key)

    # Small batch of 36x36 single-channel "images", as the forward implies.
    x = jax.random.normal(kx, (8, 1, 36, 36), jnp.float32)
    params = init_params(kp)
    ref = mlp_reference(x, params)

    # f32 path (streamed as-is, no wrapper-side copies).
    out = jax.block_until_ready(mlp_forward(x, params))
    assert out.shape == (8, 2)
    assert jnp.allclose(out, ref, atol=1e-4, rtol=1e-4)

    # Ragged batch exercises the masked final block (no padding copy in HBM).
    x_odd = jax.random.normal(kx, (13, 1, 36, 36), jnp.float32)
    out_odd = jax.block_until_ready(mlp_forward(x_odd, params))
    assert out_odd.shape == (13, 2)
    assert jnp.allclose(out_odd, mlp_reference(x_odd, params), atol=1e-4, rtol=1e-4)

    # bf16-producer path: x already bf16 in HBM -> streamed directly (half HBM traffic),
    # f32 MXU accumulation inside the kernel.
    x_bf16 = x.astype(jnp.bfloat16)
    out_bf16 = jax.block_until_ready(mlp_forward(x_bf16, params))
    assert out_bf16.shape == (8, 2)
    ref_bf16 = mlp_reference(x_bf16.astype(jnp.float32), params)
    assert jnp.allclose(out_bf16, ref_bf16, atol=5e-2, rtol=5e-2)

    print("KERNEL_OK")
</pallas_src>

<mosaic_0001>
module attributes {stable_mosaic.version = 11 : i64} {
  func.func @mlp_kernel(%arg0: i32, %arg1: memref<8x1296xf32, #tpu.memory_space<vmem>>, %arg2: memref<1296x32xf32, #tpu.memory_space<vmem>>, %arg3: memref<1x32xf32, #tpu.memory_space<vmem>>, %arg4: memref<32x16xf32, #tpu.memory_space<vmem>>, %arg5: memref<1x16xf32, #tpu.memory_space<vmem>>, %arg6: memref<16x2xf32, #tpu.memory_space<vmem>>, %arg7: memref<1x2xf32, #tpu.memory_space<vmem>>, %arg8: memref<8x2xf32, #tpu.memory_space<vmem>>) attributes {dimension_semantics = [#tpu.dimension_semantics<parallel>], iteration_bounds = array<i64: 1>, scalar_prefetch = 0 : i64, scratch_operands = 0 : i64, tpu.core_type = #tpu.core_type<tc>, window_params = [{transform_indices = @transform_0, window_bounds = array<i64: 8, 1296>}, {pipeline_mode = #tpu.pipeline_mode<synchronous>, transform_indices = @transform_1, window_bounds = array<i64: 1296, 32>}, {pipeline_mode = #tpu.pipeline_mode<synchronous>, transform_indices = @transform_2, window_bounds = array<i64: 1, 32>}, {pipeline_mode = #tpu.pipeline_mode<synchronous>, transform_indices = @transform_3, window_bounds = array<i64: 32, 16>}, {pipeline_mode = #tpu.pipeline_mode<synchronous>, transform_indices = @transform_4, window_bounds = array<i64: 1, 16>}, {pipeline_mode = #tpu.pipeline_mode<synchronous>, transform_indices = @transform_5, window_bounds = array<i64: 16, 2>}, {pipeline_mode = #tpu.pipeline_mode<synchronous>, transform_indices = @transform_6, window_bounds = array<i64: 1, 2>}, {transform_indices = @transform_7, window_bounds = array<i64: 8, 2>}]} {
    %c0 = arith.constant 0 : index
    %c0_0 = arith.constant 0 : index
    %0 = vector.load %arg1[%c0, %c0_0] : memref<8x1296xf32, #tpu.memory_space<vmem>>, vector<8x1296xf32>
    %c0_1 = arith.constant 0 : index
    %c0_2 = arith.constant 0 : index
    %1 = vector.load %arg2[%c0_1, %c0_2] : memref<1296x32xf32, #tpu.memory_space<vmem>>, vector<1296x32xf32>
    %cst = arith.constant dense<0.000000e+00> : vector<8x32xf32>
    %2 = tpu.matmul %0, %1, %cst {dimension_numbers = #tpu.dot_dimension_numbers<[1], [0], [0], [1], [0, 0, 1, 1], [], []>} : vector<8x1296xf32>, vector<1296x32xf32>, vector<8x32xf32> -> vector<8x32xf32>
    %c0_3 = arith.constant 0 : index
    %c0_4 = arith.constant 0 : index
    %3 = vector.load %arg3[%c0_3, %c0_4] : memref<1x32xf32, #tpu.memory_space<vmem>>, vector<1x32xf32>
    %4 = vector.broadcast %3 : vector<1x32xf32> to vector<8x32xf32>
    %5 = arith.addf %2, %4 : vector<8x32xf32>
    %cst_5 = arith.constant 0.000000e+00 : f32
    %6 = vector.broadcast %cst_5 : f32 to vector<8x32xf32>
    %7 = arith.maximumf %5, %6 : vector<8x32xf32>
    %c0_6 = arith.constant 0 : index
    %c0_7 = arith.constant 0 : index
    %8 = vector.load %arg4[%c0_6, %c0_7] : memref<32x16xf32, #tpu.memory_space<vmem>>, vector<32x16xf32>
    %cst_8 = arith.constant dense<0.000000e+00> : vector<8x16xf32>
    %9 = tpu.matmul %7, %8, %cst_8 {dimension_numbers = #tpu.dot_dimension_numbers<[1], [0], [0], [1], [0, 0, 1, 1], [], []>} : vector<8x32xf32>, vector<32x16xf32>, vector<8x16xf32> -> vector<8x16xf32>
    %c0_9 = arith.constant 0 : index
    %c0_10 = arith.constant 0 : index
    %10 = vector.load %arg5[%c0_9, %c0_10] : memref<1x16xf32, #tpu.memory_space<vmem>>, vector<1x16xf32>
    %11 = vector.broadcast %10 : vector<1x16xf32> to vector<8x16xf32>
    %12 = arith.addf %9, %11 : vector<8x16xf32>
    %cst_11 = arith.constant 0.000000e+00 : f32
    %13 = vector.broadcast %cst_11 : f32 to vector<8x16xf32>
    %14 = arith.maximumf %12, %13 : vector<8x16xf32>
    %c0_12 = arith.constant 0 : index
    %c0_13 = arith.constant 0 : index
    %15 = vector.load %arg6[%c0_12, %c0_13] : memref<16x2xf32, #tpu.memory_space<vmem>>, vector<16x2xf32>
    %cst_14 = arith.constant dense<0.000000e+00> : vector<8x2xf32>
    %16 = tpu.matmul %14, %15, %cst_14 {dimension_numbers = #tpu.dot_dimension_numbers<[1], [0], [0], [1], [0, 0, 1, 1], [], []>} : vector<8x16xf32>, vector<16x2xf32>, vector<8x2xf32> -> vector<8x2xf32>
    %c0_15 = arith.constant 0 : index
    %c0_16 = arith.constant 0 : index
    %17 = vector.load %arg7[%c0_15, %c0_16] : memref<1x2xf32, #tpu.memory_space<vmem>>, vector<1x2xf32>
    %18 = vector.broadcast %17 : vector<1x2xf32> to vector<8x2xf32>
    %19 = arith.addf %16, %18 : vector<8x2xf32>
    %c0_17 = arith.constant 0 : index
    %c0_18 = arith.constant 0 : index
    %20 = vector.load %arg8[%c0_17, %c0_18] : memref<8x2xf32, #tpu.memory_space<vmem>>, vector<8x2xf32>
    tpu.vector_store %arg8[%c0_17, %c0_18], %19 {strides = array<i32>} : memref<8x2xf32, #tpu.memory_space<vmem>>, vector<8x2xf32>,
    return
  }
  func.func @transform_0(%arg0: i32) -> (i32, i32) {
    %c0_i32 = arith.constant 0 : i32
    %c0_i32_0 = arith.constant 0 : i32
    return %arg0, %c0_i32 : i32, i32
  }
  func.func @transform_1(%arg0: i32) -> (i32, i32) {
    %c0_i32 = arith.constant 0 : i32
    %c0_i32_0 = arith.constant 0 : i32
    %c0_i32_1 = arith.constant 0 : i32
    return %c0_i32, %c0_i32_0 : i32, i32
  }
  func.func @transform_2(%arg0: i32) -> (i32, i32) {
    %c0_i32 = arith.constant 0 : i32
    %c0_i32_0 = arith.constant 0 : i32
    %c0_i32_1 = arith.constant 0 : i32
    return %c0_i32, %c0_i32_0 : i32, i32
  }
  func.func @transform_3(%arg0: i32) -> (i32, i32) {
    %c0_i32 = arith.constant 0 : i32
    %c0_i32_0 = arith.constant 0 : i32
    %c0_i32_1 = arith.constant 0 : i32
    return %c0_i32, %c0_i32_0 : i32, i32
  }
  func.func @transform_4(%arg0: i32) -> (i32, i32) {
    %c0_i32 = arith.constant 0 : i32
    %c0_i32_0 = arith.constant 0 : i32
    %c0_i32_1 = arith.constant 0 : i32
    return %c0_i32, %c0_i32_0 : i32, i32
  }
  func.func @transform_5(%arg0: i32) -> (i32, i32) {
    %c0_i32 = arith.constant 0 : i32
    %c0_i32_0 = arith.constant 0 : i32
    %c0_i32_1 = arith.constant 0 : i32
    return %c0_i32, %c0_i32_0 : i32, i32
  }
  func.func @transform_6(%arg0: i32) -> (i32, i32) {
    %c0_i32 = arith.constant 0 : i32
    %c0_i32_0 = arith.constant 0 : i32
    %c0_i32_1 = arith.constant 0 : i32
    return %c0_i32, %c0_i32_0 : i32, i32
  }
  func.func @transform_7(%arg0: i32) -> (i32, i32) {
    %c0_i32 = arith.constant 0 : i32
    %c0_i32_0 = arith.constant 0 : i32
    return %arg0, %c0_i32 : i32, i32
  }
}

</mosaic_0001>

<bundles_post_ra>
// kernel: mlp_forward.1
= control target key start
LH: loop header
LB: loop body
LE: loop exit
PB: predicated region body
PF: predicated region fallthrough
CT: control target
= control target key end

     0   :  { %vm203_vm0 = vcmask 130048   ;;  %vm436_vm1 = vcmask 261120   ;;  %vm490_vm2 = vcmask 15360   ;;  %s1093_s1 = inlined_call_operand.vmem [shape: f32[1296,32], index: 1, kind: input, shape index: {}]   ;;  %s1094_s2 = inlined_call_operand.vmem [shape: f32[1,32], index: 2, kind: input, shape index: {}]   ;;  %s1095_s0 = inlined_call_operand.vmem [shape: f32[8,1296], index: 0, kind: input, shape index: {}]   ;;  %s1096_s4 = inlined_call_operand.vmem [shape: f32[1,16], index: 4, kind: input, shape index: {}]   ;;  %s1097_s3 = inlined_call_operand.vmem [shape: f32[32,16], index: 3, kind: input, shape index: {}]   ;;  %s1098_s5 = inlined_call_operand.vmem [shape: f32[16,2], index: 5, kind: input, shape index: {}]   ;;  %s1099_s6 = inlined_call_operand.vmem [shape: f32[1,2], index: 6, kind: input, shape index: {}]   ;;  %s1100_s7 = inlined_call_operand.vmem [shape: f32[8,2], index: 7, kind: output, shape index: {}]  }
   0x1   :  { %v52_v0 = vld [vmem:[%s1093_s1 + $0x78] sm:$0xff]  ;;  %v51_v1 = vld [vmem:[%s1093_s1 + $0x70] sm:$0xff]  ;;  %v50_v4 = vld [vmem:[%s1093_s1 + $0x68] sm:$0xff] }
   0x2   :  { %v68_v2 = vld [vmem:[%s1093_s1 + $0xf8] sm:$0xff]  ;;  %207 = vmatpush.msra.mxu0 %v52_v0  ;;  %v67_v3 = vld [vmem:[%s1093_s1 + $0xf0] sm:$0xff]  ;;  %v66_v5 = vld [vmem:[%s1093_s1 + $0xe8] sm:$0xff] }
   0x3   :  { %227 = vmatpush.msra.mxu1 %v68_v2  ;;  %v84_v6 = vld [vmem:[%s1093_s1 + $0x178] sm:$0xff]  ;;  %v83_v7 = vld [vmem:[%s1093_s1 + $0x170] sm:$0xff]  ;;  %v49_v9 = vld [vmem:[%s1093_s1 + $0x60] sm:$0xff] }
   0x4   :  { %208 = vmatpush.msra.mxu0 %v51_v1  ;;  %v100_v8 = vld [vmem:[%s1093_s1 + $0x1f8] sm:$0xff]  ;;  %247 = vmatpush.msra.mxu2 %v84_v6  ;;  %v65_v10 = vld [vmem:[%s1093_s1 + $0xe0] sm:$0xff]  ;;  %v82_v11 = vld [vmem:[%s1093_s1 + $0x168] sm:$0xff] }
   0x5   :  { %228 = vmatpush.msra.mxu1 %v67_v3  ;;  %267 = vmatpush.msra.mxu3 %v100_v8  ;;  %v99_v12 = vld [vmem:[%s1093_s1 + $0x1f0] sm:$0xff]  ;;  %v48_v13 = vld [vmem:[%s1093_s1 + $0x58] sm:$0xff]  ;;  %v98_v15 = vld [vmem:[%s1093_s1 + $0x1e8] sm:$0xff] }
   0x6   :  { %209 = vmatpush.msra.mxu0 %v50_v4  ;;  %248 = vmatpush.msra.mxu2 %v83_v7  ;;  %v64_v14 = vld [vmem:[%s1093_s1 + $0xd8] sm:$0xff]  ;;  %v81_v16 = vld [vmem:[%s1093_s1 + $0x160] sm:$0xff]  ;;  %v47_v18 = vld [vmem:[%s1093_s1 + $0x50] sm:$0xff] }
   0x7   :  { %229 = vmatpush.msra.mxu1 %v66_v5  ;;  %268 = vmatpush.msra.mxu3 %v99_v12  ;;  %v97_v17 = vld [vmem:[%s1093_s1 + $0x1e0] sm:$0xff]  ;;  %v63_v19 = vld [vmem:[%s1093_s1 + $0xd0] sm:$0xff]  ;;  %v80_v20 = vld [vmem:[%s1093_s1 + $0x158] sm:$0xff] }
   0x8   :  { %210 = vmatpush.msra.mxu0 %v49_v9  ;;  %249 = vmatpush.msra.mxu2 %v82_v11  ;;  %v96_v21 = vld [vmem:[%s1093_s1 + $0x1d8] sm:$0xff]  ;;  %v46_v22 = vld [vmem:[%s1093_s1 + $0x48] sm:$0xff]  ;;  %v79_v24 = vld [vmem:[%s1093_s1 + $0x150] sm:$0xff] }
   0x9   :  { %230 = vmatpush.msra.mxu1 %v65_v10  ;;  %269 = vmatpush.msra.mxu3 %v98_v15  ;;  %v62_v23 = vld [vmem:[%s1093_s1 + $0xc8] sm:$0xff]  ;;  %v95_v25 = vld [vmem:[%s1093_s1 + $0x1d0] sm:$0xff]  ;;  %v45_v26 = vld [vmem:[%s1093_s1 + $0x40] sm:$0xff] }
   0xa   :  { %211 = vmatpush.msra.mxu0 %v48_v13  ;;  %250 = vmatpush.msra.mxu2 %v81_v16  ;;  %v61_v27 = vld [vmem:[%s1093_s1 + $0xc0] sm:$0xff]  ;;  %v78_v28 = vld [vmem:[%s1093_s1 + $0x148] sm:$0xff]  ;;  %v44_v30 = vld [vmem:[%s1093_s1 + $0x38] sm:$0xff] }
   0xb   :  { %231 = vmatpush.msra.mxu1 %v64_v14  ;;  %270 = vmatpush.msra.mxu3 %v97_v17  ;;  %v94_v29 = vld [vmem:[%s1093_s1 + $0x1c8] sm:$0xff]  ;;  %v60_v31 = vld [vmem:[%s1093_s1 + $0xb8] sm:$0xff]  ;;  %v77_v32 = vld [vmem:[%s1093_s1 + $0x140] sm:$0xff] }
   0xc   :  { %212 = vmatpush.msra.mxu0 %v47_v18  ;;  %251 = vmatpush.msra.mxu2 %v80_v20  ;;  %v93_v33 = vld [vmem:[%s1093_s1 + $0x1c0] sm:$0xff]  ;;  %v43_v34 = vld [vmem:[%s1093_s1 + $0x30] sm:$0xff]  ;;  %v76_v36 = vld [vmem:[%s1093_s1 + $0x138] sm:$0xff] }
   0xd   :  { %232 = vmatpush.msra.mxu1 %v63_v19  ;;  %271 = vmatpush.msra.mxu3 %v96_v21  ;;  %v59_v35 = vld [vmem:[%s1093_s1 + $0xb0] sm:$0xff]  ;;  %v92_v37 = vld [vmem:[%s1093_s1 + $0x1b8] sm:$0xff]  ;;  %v42_v38 = vld [vmem:[%s1093_s1 + $0x28] sm:$0xff] }
   0xe   :  { %213 = vmatpush.msra.mxu0 %v46_v22  ;;  %252 = vmatpush.msra.mxu2 %v79_v24  ;;  %v58_v39 = vld [vmem:[%s1093_s1 + $0xa8] sm:$0xff]  ;;  %v75_v40 = vld [vmem:[%s1093_s1 + $0x130] sm:$0xff]  ;;  %v41_v42 = vld [vmem:[%s1093_s1 + $0x20] sm:$0xff] }
   0xf   :  { %233 = vmatpush.msra.mxu1 %v62_v23  ;;  %272 = vmatpush.msra.mxu3 %v95_v25  ;;  %v91_v41 = vld [vmem:[%s1093_s1 + $0x1b0] sm:$0xff]  ;;  %v57_v43 = vld [vmem:[%s1093_s1 + $0xa0] sm:$0xff]  ;;  %v74_v44 = vld [vmem:[%s1093_s1 + $0x128] sm:$0xff] }
  0x10   :  { %214 = vmatpush.msra.mxu0 %v45_v26  ;;  %253 = vmatpush.msra.mxu2 %v78_v28  ;;  %v90_v45 = vld [vmem:[%s1093_s1 + $0x1a8] sm:$0xff]  ;;  %v40_v46 = vld [vmem:[%s1093_s1 + $0x18] sm:$0xff]  ;;  %v73_v48 = vld [vmem:[%s1093_s1 + $0x120] sm:$0xff] }
  0x11   :  { %234 = vmatpush.msra.mxu1 %v61_v27  ;;  %273 = vmatpush.msra.mxu3 %v94_v29  ;;  %v56_v47 = vld [vmem:[%s1093_s1 + $0x98] sm:$0xff]  ;;  %v89_v49 = vld [vmem:[%s1093_s1 + $0x1a0] sm:$0xff]  ;;  %v39_v50 = vld [vmem:[%s1093_s1 + $0x10] sm:$0xff] }
  0x12   :  { %215 = vmatpush.msra.mxu0 %v44_v30  ;;  %254 = vmatpush.msra.mxu2 %v77_v32  ;;  %v55_v51 = vld [vmem:[%s1093_s1 + $0x90] sm:$0xff]  ;;  %v72_v52 = vld [vmem:[%s1093_s1 + $0x118] sm:$0xff]  ;;  %v38_v54 = vld [vmem:[%s1093_s1 + $0x8] sm:$0xff] }
  0x13   :  { %235 = vmatpush.msra.mxu1 %v60_v31  ;;  %274 = vmatpush.msra.mxu3 %v93_v33  ;;  %v88_v53 = vld [vmem:[%s1093_s1 + $0x198] sm:$0xff]  ;;  %v54_v55 = vld [vmem:[%s1093_s1 + $0x88] sm:$0xff]  ;;  %v71_v56 = vld [vmem:[%s1093_s1 + $0x110] sm:$0xff] }
  0x14   :  { %216 = vmatpush.msra.mxu0 %v43_v34  ;;  %255 = vmatpush.msra.mxu2 %v76_v36  ;;  %v87_v57 = vld [vmem:[%s1093_s1 + $0x190] sm:$0xff]  ;;  %v37_v58 = vld [vmem:[%s1093_s1] sm:$0xff]  ;;  %v116_v60 = vld [vmem:[%s1093_s1 + $0x278] sm:$0xff] }
  0x15   :  { %236 = vmatpush.msra.mxu1 %v59_v35  ;;  %275 = vmatpush.msra.mxu3 %v92_v37  ;;  %v53_v59 = vld [vmem:[%s1093_s1 + $0x80] sm:$0xff]  ;;  %v132_v61 = vld [vmem:[%s1093_s1 + $0x2f8] sm:$0xff]  ;;  %v70_v62 = vld [vmem:[%s1093_s1 + $0x108] sm:$0xff] }
  0x16   :  { %217 = vmatpush.msra.mxu0 %v42_v38  ;;  %256 = vmatpush.msra.mxu2 %v75_v40  ;;  %v86_v63 = vld [vmem:[%s1093_s1 + $0x188] sm:$0xff]  ;;  %v115_v0 = vld [vmem:[%s1093_s1 + $0x270] sm:$0xff]  ;;  %v69_v2 = vld [vmem:[%s1093_s1 + $0x100] sm:$0xff] }
  0x17   :  { %237 = vmatpush.msra.mxu1 %v58_v39  ;;  %276 = vmatpush.msra.mxu3 %v91_v41  ;;  %v131_v1 = vld [vmem:[%s1093_s1 + $0x2f0] sm:$0xff]  ;;  %v85_v3 = vld [vmem:[%s1093_s1 + $0x180] sm:$0xff]  ;;  %v114_v4 = vld [vmem:[%s1093_s1 + $0x268] sm:$0xff] }
  0x18   :  { %218 = vmatpush.msra.mxu0 %v41_v42  ;;  %257 = vmatpush.msra.mxu2 %v74_v44  ;;  %v130_v5 = vld [vmem:[%s1093_s1 + $0x2e8] sm:$0xff]  ;;  %v148_v6 = vld [vmem:[%s1093_s1 + $0x378] sm:$0xff]  ;;  %v113_v8 = vld [vmem:[%s1093_s1 + $0x260] sm:$0xff] }
  0x19   :  { %238 = vmatpush.msra.mxu1 %v57_v43  ;;  %277 = vmatpush.msra.mxu3 %v90_v45  ;;  %v164_v7 = vld [vmem:[%s1093_s1 + $0x3f8] sm:$0xff]  ;;  %v129_v9 = vld [vmem:[%s1093_s1 + $0x2e0] sm:$0xff]  ;;  %v147_v10 = vld [vmem:[%s1093_s1 + $0x370] sm:$0xff] }
  0x1a   :  { %219 = vmatpush.msra.mxu0 %v40_v46  ;;  %258 = vmatpush.msra.mxu2 %v73_v48  ;;  %v163_v11 = vld [vmem:[%s1093_s1 + $0x3f0] sm:$0xff]  ;;  %v112_v12 = vld [vmem:[%s1093_s1 + $0x258] sm:$0xff]  ;;  %v146_v14 = vld [vmem:[%s1093_s1 + $0x368] sm:$0xff] }
  0x1b   :  { %239 = vmatpush.msra.mxu1 %v56_v47  ;;  %278 = vmatpush.msra.mxu3 %v89_v49  ;;  %v128_v13 = vld [vmem:[%s1093_s1 + $0x2d8] sm:$0xff]  ;;  %v162_v15 = vld [vmem:[%s1093_s1 + $0x3e8] sm:$0xff]  ;;  %v111_v16 = vld [vmem:[%s1093_s1 + $0x250] sm:$0xff] }
  0x1c   :  { %220 = vmatpush.msra.mxu0 %v39_v50  ;;  %259 = vmatpush.msra.mxu2 %v72_v52  ;;  %v127_v17 = vld [vmem:[%s1093_s1 + $0x2d0] sm:$0xff]  ;;  %v145_v18 = vld [vmem:[%s1093_s1 + $0x360] sm:$0xff]  ;;  %v110_v20 = vld [vmem:[%s1093_s1 + $0x248] sm:$0xff] }
  0x1d   :  { %240 = vmatpush.msra.mxu1 %v55_v51  ;;  %279 = vmatpush.msra.mxu3 %v88_v53  ;;  %v161_v19 = vld [vmem:[%s1093_s1 + $0x3e0] sm:$0xff]  ;;  %v126_v21 = vld [vmem:[%s1093_s1 + $0x2c8] sm:$0xff]  ;;  %v144_v22 = vld [vmem:[%s1093_s1 + $0x358] sm:$0xff] }
  0x1e   :  { %221 = vmatpush.msra.mxu0 %v38_v54  ;;  %260 = vmatpush.msra.mxu2 %v71_v56  ;;  %v160_v23 = vld [vmem:[%s1093_s1 + $0x3d8] sm:$0xff]  ;;  %v109_v24 = vld [vmem:[%s1093_s1 + $0x240] sm:$0xff]  ;;  %v143_v26 = vld [vmem:[%s1093_s1 + $0x350] sm:$0xff] }
  0x1f   :  { %241 = vmatpush.msra.mxu1 %v54_v55  ;;  %280 = vmatpush.msra.mxu3 %v87_v57  ;;  %v125_v25 = vld [vmem:[%s1093_s1 + $0x2c0] sm:$0xff]  ;;  %v159_v27 = vld [vmem:[%s1093_s1 + $0x3d0] sm:$0xff]  ;;  %v108_v28 = vld [vmem:[%s1093_s1 + $0x238] sm:$0xff] }
  0x20   :  { %222 = vmatpush.msra.mxu0 %v37_v58  ;;  %261 = vmatpush.msra.mxu2 %v70_v62  ;;  %v124_v29 = vld [vmem:[%s1093_s1 + $0x2b8] sm:$0xff]  ;;  %v142_v30 = vld [vmem:[%s1093_s1 + $0x348] sm:$0xff]  ;;  %v107_v32 = vld [vmem:[%s1093_s1 + $0x230] sm:$0xff] }
  0x21   :  { %242 = vmatpush.msra.mxu1 %v53_v59  ;;  %281 = vmatpush.msra.mxu3 %v86_v63  ;;  %v158_v31 = vld [vmem:[%s1093_s1 + $0x3c8] sm:$0xff]  ;;  %v123_v33 = vld [vmem:[%s1093_s1 + $0x2b0] sm:$0xff]  ;;  %v141_v34 = vld [vmem:[%s1093_s1 + $0x340] sm:$0xff] }
  0x22   :  { %287 = vmatpush.msrb.mxu0 %v116_v60  ;;  %262 = vmatpush.msra.mxu2 %v69_v2  ;;  %v157_v35 = vld [vmem:[%s1093_s1 + $0x3c0] sm:$0xff]  ;;  %v106_v36 = vld [vmem:[%s1093_s1 + $0x228] sm:$0xff]  ;;  %v140_v38 = vld [vmem:[%s1093_s1 + $0x338] sm:$0xff] }
  0x23   :  { %307 = vmatpush.msrb.mxu1 %v132_v61  ;;  %282 = vmatpush.msra.mxu3 %v85_v3  ;;  %v122_v37 = vld [vmem:[%s1093_s1 + $0x2a8] sm:$0xff]  ;;  %v156_v39 = vld [vmem:[%s1093_s1 + $0x3b8] sm:$0xff]  ;;  %v105_v40 = vld [vmem:[%s1093_s1 + $0x220] sm:$0xff] }
  0x24   :  { %288 = vmatpush.msrb.mxu0 %v115_v0  ;;  %327 = vmatpush.msrb.mxu2 %v148_v6  ;;  %v121_v41 = vld [vmem:[%s1093_s1 + $0x2a0] sm:$0xff]  ;;  %v139_v42 = vld [vmem:[%s1093_s1 + $0x330] sm:$0xff]  ;;  %v104_v44 = vld [vmem:[%s1093_s1 + $0x218] sm:$0xff] }
  0x25   :  { %308 = vmatpush.msrb.mxu1 %v131_v1  ;;  %347 = vmatpush.msrb.mxu3 %v164_v7  ;;  %v155_v43 = vld [vmem:[%s1093_s1 + $0x3b0] sm:$0xff]  ;;  %v120_v45 = vld [vmem:[%s1093_s1 + $0x298] sm:$0xff]  ;;  %v138_v46 = vld [vmem:[%s1093_s1 + $0x328] sm:$0xff] }
  0x26   :  { %289 = vmatpush.msrb.mxu0 %v114_v4  ;;  %328 = vmatpush.msrb.mxu2 %v147_v10  ;;  %v154_v47 = vld [vmem:[%s1093_s1 + $0x3a8] sm:$0xff]  ;;  %v103_v48 = vld [vmem:[%s1093_s1 + $0x210] sm:$0xff]  ;;  %v137_v50 = vld [vmem:[%s1093_s1 + $0x320] sm:$0xff] }
  0x27   :  { %309 = vmatpush.msrb.mxu1 %v130_v5  ;;  %348 = vmatpush.msrb.mxu3 %v163_v11  ;;  %v119_v49 = vld [vmem:[%s1093_s1 + $0x290] sm:$0xff]  ;;  %v153_v51 = vld [vmem:[%s1093_s1 + $0x3a0] sm:$0xff]  ;;  %v102_v52 = vld [vmem:[%s1093_s1 + $0x208] sm:$0xff] }
  0x28   :  { %290 = vmatpush.msrb.mxu0 %v113_v8  ;;  %329 = vmatpush.msrb.mxu2 %v146_v14  ;;  %v28_v53 = vld [vmem:[%s1095_s0 + $0x10] sm:$0xff]  ;;  %v118_v54 = vld [vmem:[%s1093_s1 + $0x288] sm:$0xff]  ;;  %v136_v55 = vld [vmem:[%s1093_s1 + $0x318] sm:$0xff] }
  0x29   :  { %310 = vmatpush.msrb.mxu1 %v129_v9  ;;  %349 = vmatpush.msrb.mxu3 %v162_v15  ;;  %v101_v56 = vld [vmem:[%s1093_s1 + $0x200] sm:$0xff]  ;;  %v29_v57 = vld [vmem:[%s1095_s0 + $0x18] sm:$0xff]  ;;  %v135_v61 = vld [vmem:[%s1093_s1 + $0x310] sm:$0xff] }
  0x2a   :  { %291 = vmatpush.msrb.mxu0 %v112_v12  ;;  %330 = vmatpush.msrb.mxu2 %v145_v18  ;;  %v26_v58 = vld [vmem:[%s1095_s0] sm:$0xff]  ;;  %v180_v60 = vld [vmem:[%s1093_s1 + $0x478] sm:$0xff]  ;;  %v27_v63 = vld [vmem:[%s1095_s0 + $0x8] sm:$0xff] }
  0x2b   :  { %311 = vmatpush.msrb.mxu1 %v128_v13  ;;  %350 = vmatpush.msrb.mxu3 %v161_v19  ;;  %v117_v59 = vld [vmem:[%s1093_s1 + $0x280] sm:$0xff]  ;;  %v152_v62 = vld [vmem:[%s1093_s1 + $0x398] sm:$0xff]  ;;  %v179_v0 = vld [vmem:[%s1093_s1 + $0x470] sm:$0xff] }
  0x2c   :  { %292 = vmatpush.msrb.mxu0 %v111_v16  ;;  %331 = vmatpush.msrb.mxu2 %v144_v22  ;;  %v196_v1 = vld [vmem:[%s1093_s1 + $0x4f8] sm:$0xff]  ;;  %v134_v2 = vld [vmem:[%s1093_s1 + $0x308] sm:$0xff]  ;;  %v151_v3 = vld [vmem:[%s1093_s1 + $0x390] sm:$0xff] }
  0x2d   :  { %312 = vmatpush.msrb.mxu1 %v127_v17  ;;  %351 = vmatpush.msrb.mxu3 %v160_v23  ;;  %v178_v4 = vld [vmem:[%s1093_s1 + $0x468] sm:$0xff]  ;;  %v195_v5 = vld [vmem:[%s1093_s1 + $0x4f0] sm:$0xff]  ;;  %v133_v6 = vld [vmem:[%s1093_s1 + $0x300] sm:$0xff] }
  0x2e   :  { %293 = vmatpush.msrb.mxu0 %v110_v20  ;;  %332 = vmatpush.msrb.mxu2 %v143_v26  ;;  %v150_v7 = vld [vmem:[%s1093_s1 + $0x388] sm:$0xff]  ;;  %v32_v8 = vld [vmem:[%s1095_s0 + $0x30] sm:$0xff]  ;;  %v177_v9 = vld [vmem:[%s1093_s1 + $0x460] sm:$0xff] }
  0x2f   :  { %313 = vmatpush.msrb.mxu1 %v126_v21  ;;  %352 = vmatpush.msrb.mxu3 %v159_v27  ;;  %v194_v10 = vld [vmem:[%s1093_s1 + $0x4e8] sm:$0xff]  ;;  %v149_v11 = vld [vmem:[%s1093_s1 + $0x380] sm:$0xff]  ;;  %v33_v13 = vld [vmem:[%s1095_s0 + $0x38] sm:$0xff] }
  0x30   :  { %294 = vmatpush.msrb.mxu0 %v109_v24  ;;  %333 = vmatpush.msrb.mxu2 %v142_v30  ;;  %v30_v12 = vld [vmem:[%s1095_s0 + $0x20] sm:$0xff]  ;;  %v176_v14 = vld [vmem:[%s1093_s1 + $0x458] sm:$0xff]  ;;  %v31_v16 = vld [vmem:[%s1095_s0 + $0x28] sm:$0xff] }
  0x31   :  { %314 = vmatpush.msrb.mxu1 %v125_v25  ;;  %353 = vmatpush.msrb.mxu3 %v158_v31  ;;  %v193_v15 = vld [vmem:[%s1093_s1 + $0x4e0] sm:$0xff]  ;;  %v198_v17 = vld [vmem:[%s1093_s1 + $0x508] sm:$0xff]  ;;  %v175_v18 = vld [vmem:[%s1093_s1 + $0x450] sm:$0xff] }
  0x32   :  { %295 = vmatpush.msrb.mxu0 %v108_v28  ;;  %334 = vmatpush.msrb.mxu2 %v141_v34  ;;  %v192_v19 = vld [vmem:[%s1093_s1 + $0x4d8] sm:$0xff]  ;;  %v197_v20 = vld [vmem:[%s1093_s1 + $0x500] sm:$0xff]  ;;  %v174_v21 = vld [vmem:[%s1093_s1 + $0x448] sm:$0xff] }
  0x33   :  { %315 = vmatpush.msrb.mxu1 %v124_v29  ;;  %354 = vmatpush.msrb.mxu3 %v157_v35  ;;  %v191_v22 = vld [vmem:[%s1093_s1 + $0x4d0] sm:$0xff]  ;;  %v173_v24 = vld [vmem:[%s1093_s1 + $0x440] sm:$0xff]  ;;  %v190_v25 = vld [vmem:[%s1093_s1 + $0x4c8] sm:$0xff] }
  0x34   :  { %296 = vmatpush.msrb.mxu0 %v107_v32  ;;  %335 = vmatpush.msrb.mxu2 %v140_v38  ;;  %v36_v23 = vld [vmem:[%s1095_s0 + $0x50] sm:$0xff]  ;;  %v172_v26 = vld [vmem:[%s1093_s1 + $0x438] sm:$0xff]  ;;  %v189_v27 = vld [vmem:[%s1093_s1 + $0x4c0] sm:$0xff] }
  0x35   :  { %316 = vmatpush.msrb.mxu1 %v123_v33  ;;  %355 = vmatpush.msrb.mxu3 %v156_v39  ;;  %v171_v28 = vld [vmem:[%s1093_s1 + $0x430] sm:$0xff]  ;;  %v188_v29 = vld [vmem:[%s1093_s1 + $0x4b8] sm:$0xff]  ;;  %v170_v30 = vld [vmem:[%s1093_s1 + $0x428] sm:$0xff] }
  0x36   :  { %297 = vmatpush.msrb.mxu0 %v106_v36  ;;  %336 = vmatpush.msrb.mxu2 %v139_v42  ;;  %v187_v31 = vld [vmem:[%s1093_s1 + $0x4b0] sm:$0xff]  ;;  %v169_v32 = vld [vmem:[%s1093_s1 + $0x420] sm:$0xff]  ;;  %v186_v33 = vld [vmem:[%s1093_s1 + $0x4a8] sm:$0xff] }
  0x37   :  { %317 = vmatpush.msrb.mxu1 %v122_v37  ;;  %356 = vmatpush.msrb.mxu3 %v155_v43  ;;  %v168_v34 = vld [vmem:[%s1093_s1 + $0x418] sm:$0xff]  ;;  %v185_v35 = vld [vmem:[%s1093_s1 + $0x4a0] sm:$0xff]  ;;  %v167_v36 = vld [vmem:[%s1093_s1 + $0x410] sm:$0xff] }
  0x38   :  { %298 = vmatpush.msrb.mxu0 %v105_v40  ;;  %337 = vmatpush.msrb.mxu2 %v138_v46  ;;  %v184_v37 = vld [vmem:[%s1093_s1 + $0x498] sm:$0xff]  ;;  %v166_v38 = vld [vmem:[%s1093_s1 + $0x408] sm:$0xff]  ;;  %v183_v39 = vld [vmem:[%s1093_s1 + $0x490] sm:$0xff] }
  0x39   :  { %318 = vmatpush.msrb.mxu1 %v121_v41  ;;  %357 = vmatpush.msrb.mxu3 %v154_v47  ;;  %v165_v40 = vld [vmem:[%s1093_s1 + $0x400] sm:$0xff]  ;;  %v182_v41 = vld [vmem:[%s1093_s1 + $0x488] sm:$0xff]  ;;  %v431_v47 = vld [vmem:[%s1097_s3 + $0x18] sm:$0xff] }
  0x3a   :  { %299 = vmatpush.msrb.mxu0 %v104_v44  ;;  %338 = vmatpush.msrb.mxu2 %v137_v50  ;;  %v34_v42 = vld [vmem:[%s1095_s0 + $0x40] sm:$0xff]  ;;  %v35_v44 = vld [vmem:[%s1095_s0 + $0x48] sm:$0xff] }
  0x3b   :  { %319 = vmatpush.msrb.mxu1 %v120_v45  ;;  %358 = vmatpush.msrb.mxu3 %v153_v51  ;;  %v181_v43 = vld [vmem:[%s1093_s1 + $0x480] sm:$0xff]  ;;  %v429_v51 = vld [vmem:[%s1097_s3 + $0x8] sm:$0xff] }
  0x3c   :  { %300 = vmatpush.msrb.mxu0 %v103_v48  ;;  %263 = vmatmul.f32.vlgmr.msra.gmra.mxu2 %v28_v53  ;;  %v499_v45 = vld [vmem:[%s1094_s2] ss:$0 sm:$0xff] }
  0x3d   :  { %320 = vmatpush.msrb.mxu1 %v119_v49  ;;  %339 = vmatpush.msrb.mxu2 %v136_v55  ;;  %v430_v49 = vld [vmem:[%s1097_s3 + $0x10] sm:$0xff]  ;;  %v428_v53 = vld [vmem:[%s1097_s3] sm:$0xff]  ;;  %v462_v55 = vld [vmem:[%s1098_s5 + $0x8] sm:$0xff] }
  0x3e   :  { %301 = vmatpush.msrb.mxu0 %v102_v52  ;;  %283 = vmatmul.f32.vlgmr.msra.gmra.mxu3 %v29_v57 }
  0x3f   :  { %321 = vmatpush.msrb.mxu1 %v118_v54  ;;  %223 = vmatmul.f32.vlgmr.msra.gmra.mxu0 %v26_v58 }
  0x40   :  { %302 = vmatpush.msrb.mxu0 %v101_v56  ;;  %340 = vmatpush.msrb.mxu2 %v135_v61 }
  0x41   :  { %322 = vmatpush.msrb.mxu1 %v117_v59  ;;  %359 = vmatpush.msrb.mxu3 %v152_v62 }
  0x42   :  { %367 = vmatpush.msra.mxu0 %v180_v60  ;;  %243 = vmatmul.f32.vlgmr.msra.gmra.mxu1 %v27_v63 }
  0x43   :  { %387 = vmatpush.msra.mxu1 %v196_v1  ;;  %341 = vmatpush.msrb.mxu2 %v134_v2 }
  0x44   :  { %368 = vmatpush.msra.mxu0 %v179_v0  ;;  %360 = vmatpush.msrb.mxu3 %v151_v3 }
  0x45   :  { %388 = vmatpush.msra.mxu1 %v195_v5  ;;  %342 = vmatpush.msrb.mxu2 %v133_v6 }
  0x46   :  { %369 = vmatpush.msra.mxu0 %v178_v4  ;;  %361 = vmatpush.msrb.mxu3 %v150_v7 }
  0x47   :  { %343 = vmatmul.f32.vlgmr.msrb.gmra.mxu2 %v32_v8  ;;  %389 = vmatpush.msra.mxu1 %v194_v10  ;;  %v461_v10 = vld [vmem:[%s1098_s5] sm:$0xff] }
  0x48   :  { %370 = vmatpush.msra.mxu0 %v177_v9  ;;  %362 = vmatpush.msrb.mxu3 %v149_v11  ;;  %v500_v11 = vld [vmem:[%s1096_s4] ss:$0 sm:$0xff] }
  0x49   :  { %303 = vmatmul.f32.vlgmr.msrb.gmra.mxu0 %v30_v12  ;;  %363 = vmatmul.f32.vlgmr.msrb.gmra.mxu3 %v33_v13 }
  0x4a   :  { %371 = vmatpush.msra.mxu0 %v176_v14  ;;  %390 = vmatpush.msra.mxu1 %v193_v15  ;;  %v501_v15 = vld [vmem:[%s1099_s6] ss:$0 sm:$0xff] }
  0x4b   :  { %323 = vmatmul.f32.vlgmr.msrb.gmra.mxu1 %v31_v16  ;;  %421 = vmatpush.msra.mxu2 %v198_v17 }
  0x4c   :  { %372 = vmatpush.msra.mxu0 %v175_v18  ;;  %391 = vmatpush.msra.mxu1 %v192_v19 }
  0x4d   :  { %422 = vmatpush.msra.mxu2 %v197_v20  ;;  %452 = vmatpush.msra.mxu3 %v431_v47 }
  0x4e   :  { %373 = vmatpush.msra.mxu0 %v174_v21  ;;  %392 = vmatpush.msra.mxu1 %v191_v22 }
  0x4f   :  { %496 = vmatmul.msk.f32.vlgmr.msra.gmra.mxu2 %vm203_vm0, %v36_v23  ;;  %453 = vmatpush.msra.mxu3 %v430_v49 }
  0x50   :  { %374 = vmatpush.msra.mxu0 %v173_v24  ;;  %393 = vmatpush.msra.mxu1 %v190_v25 }
  0x51   :  { %454 = vmatpush.msra.mxu3 %v429_v51  ;;  %484 = vmatpush.msrb.mxu2 %v462_v55 }
  0x52   :  { %375 = vmatpush.msra.mxu0 %v172_v26  ;;  %394 = vmatpush.msra.mxu1 %v189_v27 }
  0x53   :  { %455 = vmatpush.msra.mxu3 %v428_v53  ;;  %485 = vmatpush.msrb.mxu2 %v461_v10 }
  0x54   :  { %376 = vmatpush.msra.mxu0 %v171_v28  ;;  %395 = vmatpush.msra.mxu1 %v188_v29 }
  0x56   :  { %377 = vmatpush.msra.mxu0 %v170_v30  ;;  %396 = vmatpush.msra.mxu1 %v187_v31 }
  0x58   :  { %378 = vmatpush.msra.mxu0 %v169_v32  ;;  %397 = vmatpush.msra.mxu1 %v186_v33 }
  0x5a   :  { %379 = vmatpush.msra.mxu0 %v168_v34  ;;  %398 = vmatpush.msra.mxu1 %v185_v35 }
  0x5c   :  { %380 = vmatpush.msra.mxu0 %v167_v36  ;;  %399 = vmatpush.msra.mxu1 %v184_v37 }
  0x5e   :  { %381 = vmatpush.msra.mxu0 %v166_v38  ;;  %400 = vmatpush.msra.mxu1 %v183_v39 }
  0x60   :  { %382 = vmatpush.msra.mxu0 %v165_v40  ;;  %401 = vmatpush.msra.mxu1 %v182_v41 }
  0x61   :  { %383 = vmatmul.f32.vlgmr.msra.gmra.mxu0 %v34_v42 }
  0x62   :  { %402 = vmatpush.msra.mxu1 %v181_v43 }
  0x63   :  { %403 = vmatmul.f32.vlgmr.msra.gmra.mxu1 %v35_v44 }
  0xbc   :  { %v224_v46 = vpop.f32.mrf.mxu0 }
  0xbd   :  { %v225_v48 = vadd.f32 %v499_v45, %v224_v46 }
  0xbf   :  { %v244_v50 = vpop.f32.mrf.mxu1  ;;  %v264_v54 = vpop.f32.mrf.mxu2 }
  0xc0   :  { %v245_v52 = vadd.f32 %v244_v50, %v225_v48 }
  0xc1   :  { %v284_v57 = vpop.f32.mrf.mxu3 }
  0xc2   :  { %v265_v56 = vadd.f32 %v264_v54, %v245_v52 }
  0xc4   :  { %v285_v58 = vadd.f32 %v284_v57, %v265_v56 }
  0xc6   :  { %v304_v59 = vpop.f32.mrf.mxu0 }
  0xc7   :  { %v305_v60 = vadd.f32 %v304_v59, %v285_v58 }
  0xc8   :  { %v324_v61 = vpop.f32.mrf.mxu1 }
  0xc9   :  { %v325_v62 = vadd.f32 %v324_v61, %v305_v60 }
  0xca   :  { %v344_v63 = vpop.f32.mrf.mxu2 }
  0xcb   :  { %v345_v0 = vadd.f32 %v344_v63, %v325_v62 }
  0xcc   :  { %v364_v1 = vpop.f32.mrf.mxu3 }
  0xcd   :  { %v365_v2 = vadd.f32 %v364_v1, %v345_v0 }
  0xd2   :  { %v424_v6 = vpop.f32.mrf.mxu2 }
  0xde   :  { %v384_v3 = vpop.f32.mrf.mxu0 }
  0xdf   :  { %v385_v4 = vadd.f32 %v384_v3, %v365_v2 }
  0xe0   :  { %v404_v5 = vpop.f32.mrf.mxu1 }
  0xe1   :  { %v405_v7 = vadd.f32 %v404_v5, %v385_v4 }
  0xe3   :  { %v425_v8 = vadd.f32 %v424_v6, %v405_v7 }
  0xe5   :  { %v427_v9 = vmax.f32 %v425_v8, 0.0 }
  0xe7   :  { %497 = vmatmul.msk.f32.vlgmr.msra.gmra.mxu3 %vm436_vm1, %v427_v9 }
 0x16a   :  { %v457_v12 = vpop.f32.mrf.mxu3 }
 0x16b   :  { %v458_v13 = vadd.f32 %v500_v11, %v457_v12 }
 0x16d   :  { %v460_v14 = vmax.f32 %v458_v13, 0.0 }
 0x16f   :  { %498 = vmatmul.msk.f32.vlgmr.msrb.gmra.mxu2 %vm203_vm0, %v460_v14 }
 0x1f2   :  { %v487_v16 = vpop.f32.mrf.mxu2 }
 0x1f3   :  { %v488_v17 = vadd.f32 %v501_v15, %v487_v16 }
 0x1f5   :  { %491 = vst.msk [vmem:[%s1100_s7] sm:$0xff] %vm490_vm2, %v488_v17 }

</bundles_post_ra>
